<compile_context>
chip_gen: v6e
topology: v6e:2x2x1
jax: 0.10.0
libtpu: 0.0.40
codegen_flags: <defaults>
</compile_context>

<pallas_src>
import math
import numpy as np
import jax
import jax.numpy as jnp
from jax.experimental import pallas as pl
from jax.experimental.pallas import tpu as pltpu

# small, module-consistent shapes
B, T, D, H, DFF = 2, 8, 32, 4, 64
DK = D // H
BT = B * T            # 16 folded activation rows
R = B * H * T         # 64 packed attention rows, ordered (h, b, t)
EPS = 1e-6            # LayerNorm eps (torch adds it to the unbiased std)


# ---------------- in-kernel helpers (traced into the kernel body) -----------

def _layer_norm(x, a, b):
    # torch module: a*(x-mean)/(std+eps)+b with unbiased std.  rsqrt(var+eps)
    # deviates by O(eps) but costs one EUP push instead of sqrt+add+recip.
    mean = jnp.mean(x, axis=-1, keepdims=True)
    var = jnp.sum((x - mean) ** 2, axis=-1, keepdims=True) / (x.shape[-1] - 1)
    return a * (x - mean) * jax.lax.rsqrt(var + EPS) + b


# ------------------------------- kernel --------------------------------------

def encoder_layer_kernel(x_ref, amask_ref, hmask_qkv_ref, hmask_ctx_ref,
                         wstack_ref, bqkv_ref, wo_ref, bo_ref,
                         w1_ref, b1_ref, w2_ref, b2_ref,
                         ln_a_ref, ln_b_ref, o_ref):
    x = x_ref[...]                                       # (BT, D) f32
    inv_sqrt_dk = 1.0 / math.sqrt(DK)

    # ---- sublayer 0: x + self_attn(norm(x), norm(x), norm(x), mask) --------
    y = _layer_norm(x, ln_a_ref[0], ln_b_ref[0])         # (BT, D)

    # Block-diagonal packed QKV projection.  Packed rows are (h, b, t); the
    # constant head mask zeroes every off-head D-block of the replicated
    # activations, so one (R, H*D) x (H*D, 3*DK) matmul yields per-head Q|K|V
    # directly in the packed row layout (no per-head slicing / stacking).
    y_lane = jnp.concatenate([y] * H, axis=1)            # (BT, H*D)
    y_rep = jnp.concatenate([y_lane] * H, axis=0)        # (R, H*D)
    y_bd = y_rep * hmask_qkv_ref[...]
    qkv = jnp.dot(y_bd, wstack_ref[...],
                  preferred_element_type=jnp.float32) + bqkv_ref[...]   # (R, 3*DK)
    q = qkv[:, 0:DK]
    k = qkv[:, DK:2 * DK]
    v = qkv[:, 2 * DK:3 * DK]

    # Single (R, R) score matmul; the precomputed additive mask carries both
    # the block-diagonal (same head, same batch) structure and the key pad
    # mask, so only one VPU add is needed in-kernel.
    s = jax.lax.dot_general(q, k, (((1,), (1,)), ((), ())),
                            preferred_element_type=jnp.float32) * inv_sqrt_dk
    s = s + amask_ref[...]
    s = s - jnp.max(s, axis=-1, keepdims=True)
    p = jnp.exp(s)
    p = p * pl.reciprocal(jnp.sum(p, axis=-1, keepdims=True), approx=True)
    ctx = jnp.dot(p, v, preferred_element_type=jnp.float32)             # (R, DK)

    # Output projection: re-expand ctx block-diagonally onto Wo's (h, dk) row
    # layout -> ONE (R, D) x (D, D) matmul, then sum the H head row-blocks.
    ctx_bd = jnp.concatenate([ctx] * H, axis=1) * hmask_ctx_ref[...]    # (R, D)
    attn_h = jnp.dot(ctx_bd, wo_ref[...], preferred_element_type=jnp.float32)
    attn = bo_ref[...]
    for h in range(H):                                    # 3 sublane-aligned adds
        attn = attn + attn_h[h * BT:(h + 1) * BT]
    x = x + attn

    # ---- sublayer 1: x + feed_forward(norm(x))  (w2(relu(w1(x)))) ----------
    y = _layer_norm(x, ln_a_ref[1], ln_b_ref[1])
    hid = jnp.maximum(
        jnp.dot(y, w1_ref[...], preferred_element_type=jnp.float32) + b1_ref[...],
        0.0)
    x = x + jnp.dot(hid, w2_ref[...], preferred_element_type=jnp.float32) + b2_ref[...]

    o_ref[...] = x.astype(o_ref.dtype)


# ------------------------------- wrapper --------------------------------------

def _vmem_spec():
    return pl.BlockSpec(memory_space=pltpu.MemorySpace.VMEM)


def build_additive_mask(mask):
    """(R, R) additive mask: 0 where (same head, same batch, key unpadded), else -1e9."""
    r = jnp.arange(R)
    h = r // (B * T)
    b = (r % (B * T)) // T
    t = r % T
    key_ok = mask.reshape(B, T)[b, t] != 0.0                       # (R,) per column
    valid = (h[:, None] == h[None, :]) & (b[:, None] == b[None, :]) & key_ok[None, :]
    return jnp.where(valid, 0.0, -1e9).astype(jnp.float32)


def encoder_layer(x, mask, kparams):
    amask = build_additive_mask(mask)                    # precomputed in the wrapper
    operands = (x.reshape(BT, D), amask) + tuple(kparams)
    out = pl.pallas_call(
        encoder_layer_kernel,
        out_shape=jax.ShapeDtypeStruct((BT, D), jnp.float32),
        in_specs=[_vmem_spec() for _ in operands],       # whole problem resident: no grid
        out_specs=_vmem_spec(),
    )(*operands)
    return out.reshape(B, T, D)


# ------------------------- numpy reference (module-faithful) ------------------

def reference(x, mask, wq, wk, wv, wo, bq, bk, bv, bo, w1, b1, w2, b2, ln_a, ln_b):
    def ln(xb, a, b):
        mean = xb.mean(-1, keepdims=True)
        var = ((xb - mean) ** 2).sum(-1, keepdims=True) / (xb.shape[-1] - 1)
        return a * (xb - mean) / (np.sqrt(var) + EPS) + b

    def mha(xi, m):
        q, k, v = xi @ wq + bq, xi @ wk + bk, xi @ wv + bv
        outs = []
        for h in range(H):
            qh = q[:, h * DK:(h + 1) * DK]
            kh = k[:, h * DK:(h + 1) * DK]
            vh = v[:, h * DK:(h + 1) * DK]
            s = qh @ kh.T / math.sqrt(DK)
            s = np.where(m == 0.0, -1e9, s)
            s = s - s.max(-1, keepdims=True)
            p = np.exp(s); p = p / p.sum(-1, keepdims=True)
            outs.append(p @ vh)
        return np.concatenate(outs, -1) @ wo + bo

    out = np.zeros((B, T, D), np.float32)
    for bi in range(B):
        xb = x[bi]
        y = ln(xb, ln_a[0], ln_b[0]); xb = xb + mha(y, mask[bi])
        y = ln(xb, ln_a[1], ln_b[1])
        xb = xb + np.maximum(y @ w1 + b1, 0.0) @ w2 + b2
        out[bi] = xb
    return out


# --------------------------------- main ---------------------------------------

if __name__ == "__main__":
    key = jax.random.PRNGKey(0)
    ks = jax.random.split(key, 16)
    scale = 0.1

    x = jax.random.normal(ks[0], (B, T, D), jnp.float32)
    mask = np.ones((B, 1, T), np.float32)
    mask[1, 0, T - 3:] = 0.0       # pad-mask the last 3 positions of batch 1
    mask = jnp.asarray(mask)

    # module-native parameters (torch-Linear style, expressed as (in, out) mats)
    wq = jax.random.normal(ks[1], (D, D), jnp.float32) * scale
    wk = jax.random.normal(ks[2], (D, D), jnp.float32) * scale
    wv = jax.random.normal(ks[3], (D, D), jnp.float32) * scale
    wo = jax.random.normal(ks[4], (D, D), jnp.float32) * scale
    bq = jax.random.normal(ks[5], (D,), jnp.float32) * scale
    bk = jax.random.normal(ks[6], (D,), jnp.float32) * scale
    bv = jax.random.normal(ks[7], (D,), jnp.float32) * scale
    bo = jax.random.normal(ks[8], (D,), jnp.float32) * scale
    w1 = jax.random.normal(ks[9], (D, DFF), jnp.float32) * scale
    b1 = jax.random.normal(ks[10], (DFF,), jnp.float32) * scale
    w2 = jax.random.normal(ks[11], (DFF, D), jnp.float32) * scale
    b2 = jax.random.normal(ks[12], (D,), jnp.float32) * scale
    ln_a = 1.0 + 0.02 * jax.random.normal(ks[13], (2, D), jnp.float32)
    ln_b = 0.02 * jax.random.normal(ks[14], (2, D), jnp.float32)

    # ---- pack for the kernel: block-diagonal QKV weights / bias, head masks --
    wq_np, wk_np, wv_np = np.asarray(wq), np.asarray(wk), np.asarray(wv)
    bq_np, bk_np, bv_np = np.asarray(bq), np.asarray(bk), np.asarray(bv)

    wstack = np.zeros((H * D, 3 * DK), np.float32)          # rows (h, d), cols q|k|v dk
    bqkv_pack = np.zeros((R, 3 * DK), np.float32)           # rows (h, b, t)
    for h in range(H):
        wstack[h * D:(h + 1) * D, 0:DK] = wq_np[:, h * DK:(h + 1) * DK]
        wstack[h * D:(h + 1) * D, DK:2 * DK] = wk_np[:, h * DK:(h + 1) * DK]
        wstack[h * D:(h + 1) * D, 2 * DK:3 * DK] = wv_np[:, h * DK:(h + 1) * DK]
        bqkv_pack[h * BT:(h + 1) * BT, 0:DK] = bq_np[h * DK:(h + 1) * DK]
        bqkv_pack[h * BT:(h + 1) * BT, DK:2 * DK] = bk_np[h * DK:(h + 1) * DK]
        bqkv_pack[h * BT:(h + 1) * BT, 2 * DK:3 * DK] = bv_np[h * DK:(h + 1) * DK]

    row_h = np.arange(R) // BT
    hmask_qkv = (row_h[:, None] == (np.arange(H * D) // D)[None, :]).astype(np.float32)
    hmask_ctx = (row_h[:, None] == (np.arange(D) // DK)[None, :]).astype(np.float32)

    kparams = (jnp.asarray(hmask_qkv), jnp.asarray(hmask_ctx),
               jnp.asarray(wstack), jnp.asarray(bqkv_pack),
               wo, bo.reshape(1, D),
               w1, b1.reshape(1, DFF), w2, b2.reshape(1, D),
               ln_a, ln_b)

    out = encoder_layer(x, mask, kparams)
    out = jax.block_until_ready(out)

    ref = reference(np.asarray(x), np.asarray(mask),
                    *[np.asarray(p) for p in (wq, wk, wv, wo, bq, bk, bv, bo,
                                              w1, b1, w2, b2, ln_a, ln_b)])
    np.testing.assert_allclose(np.asarray(out), ref, rtol=1e-2, atol=1e-2)

    print("KERNEL_OK")
</pallas_src>

<mosaic_0001>
module attributes {stable_mosaic.version = 11 : i64} {
  func.func @encoder_layer_kernel(%arg0: memref<16x32xf32, #tpu.memory_space<vmem>>, %arg1: memref<64x64xf32, #tpu.memory_space<vmem>>, %arg2: memref<64x128xf32, #tpu.memory_space<vmem>>, %arg3: memref<64x32xf32, #tpu.memory_space<vmem>>, %arg4: memref<128x24xf32, #tpu.memory_space<vmem>>, %arg5: memref<64x24xf32, #tpu.memory_space<vmem>>, %arg6: memref<32x32xf32, #tpu.memory_space<vmem>>, %arg7: memref<1x32xf32, #tpu.memory_space<vmem>>, %arg8: memref<32x64xf32, #tpu.memory_space<vmem>>, %arg9: memref<1x64xf32, #tpu.memory_space<vmem>>, %arg10: memref<64x32xf32, #tpu.memory_space<vmem>>, %arg11: memref<1x32xf32, #tpu.memory_space<vmem>>, %arg12: memref<2x32xf32, #tpu.memory_space<vmem>>, %arg13: memref<2x32xf32, #tpu.memory_space<vmem>>, %arg14: memref<16x32xf32, #tpu.memory_space<vmem>>) attributes {dimension_semantics = [], scalar_prefetch = 0 : i64, scratch_operands = 0 : i64, tpu.core_type = #tpu.core_type<tc>} {
    %c0 = arith.constant 0 : index
    %c0_0 = arith.constant 0 : index
    %0 = vector.load %arg0[%c0, %c0_0] : memref<16x32xf32, #tpu.memory_space<vmem>>, vector<16x32xf32>
    %c0_1 = arith.constant 0 : index
    %c0_2 = arith.constant 0 : index
    %1 = vector.load %arg12[%c0_1, %c0_2] : memref<2x32xf32, #tpu.memory_space<vmem>>, vector<1x32xf32>
    %2 = vector.shape_cast %1 : vector<1x32xf32> to vector<32xf32>
    %c0_3 = arith.constant 0 : index
    %c0_4 = arith.constant 0 : index
    %3 = vector.load %arg13[%c0_3, %c0_4] : memref<2x32xf32, #tpu.memory_space<vmem>>, vector<1x32xf32>
    %4 = vector.shape_cast %3 : vector<1x32xf32> to vector<32xf32>
    %cst = arith.constant dense<0.000000e+00> : vector<16xf32>
    %5 = vector.multi_reduction <add>, %0, %cst [1] : vector<16x32xf32> to vector<16xf32>
    %6 = vector.shape_cast %5 : vector<16xf32> to vector<16x1xf32>
    %cst_5 = arith.constant 3.200000e+01 : f32
    %7 = vector.broadcast %cst_5 : f32 to vector<16x1xf32>
    %8 = arith.divf %6, %7 : vector<16x1xf32>
    %9 = vector.broadcast %8 : vector<16x1xf32> to vector<16x32xf32>
    %10 = arith.subf %0, %9 : vector<16x32xf32>
    %11 = arith.mulf %10, %10 : vector<16x32xf32>
    %cst_6 = arith.constant dense<0.000000e+00> : vector<16xf32>
    %12 = vector.multi_reduction <add>, %11, %cst_6 [1] : vector<16x32xf32> to vector<16xf32>
    %13 = vector.shape_cast %12 : vector<16xf32> to vector<16x1xf32>
    %cst_7 = arith.constant 3.100000e+01 : f32
    %14 = vector.broadcast %cst_7 : f32 to vector<16x1xf32>
    %15 = arith.divf %13, %14 : vector<16x1xf32>
    %16 = vector.broadcast %8 : vector<16x1xf32> to vector<16x32xf32>
    %17 = arith.subf %0, %16 : vector<16x32xf32>
    %18 = vector.shape_cast %2 : vector<32xf32> to vector<1x32xf32>
    %19 = vector.broadcast %18 : vector<1x32xf32> to vector<16x32xf32>
    %20 = arith.mulf %19, %17 : vector<16x32xf32>
    %cst_8 = arith.constant 9.99999997E-7 : f32
    %21 = vector.broadcast %cst_8 : f32 to vector<16x1xf32>
    %22 = arith.addf %15, %21 : vector<16x1xf32>
    %23 = math.rsqrt %22 : vector<16x1xf32>
    %24 = vector.broadcast %23 : vector<16x1xf32> to vector<16x32xf32>
    %25 = arith.mulf %20, %24 : vector<16x32xf32>
    %26 = vector.shape_cast %4 : vector<32xf32> to vector<1x32xf32>
    %27 = vector.broadcast %26 : vector<1x32xf32> to vector<16x32xf32>
    %28 = arith.addf %25, %27 : vector<16x32xf32>
    %29 = tpu.concatenate %28, %28, %28, %28 in 1 : vector<16x32xf32>, vector<16x32xf32>, vector<16x32xf32>, vector<16x32xf32> -> vector<16x128xf32>
    %30 = tpu.concatenate %29, %29, %29, %29 in 0 : vector<16x128xf32>, vector<16x128xf32>, vector<16x128xf32>, vector<16x128xf32> -> vector<64x128xf32>
    %c0_9 = arith.constant 0 : index
    %c0_10 = arith.constant 0 : index
    %31 = vector.load %arg2[%c0_9, %c0_10] : memref<64x128xf32, #tpu.memory_space<vmem>>, vector<64x128xf32>
    %32 = arith.mulf %30, %31 : vector<64x128xf32>
    %c0_11 = arith.constant 0 : index
    %c0_12 = arith.constant 0 : index
    %33 = vector.load %arg4[%c0_11, %c0_12] : memref<128x24xf32, #tpu.memory_space<vmem>>, vector<128x24xf32>
    %cst_13 = arith.constant dense<0.000000e+00> : vector<64x24xf32>
    %34 = tpu.matmul %32, %33, %cst_13 {dimension_numbers = #tpu.dot_dimension_numbers<[1], [0], [0], [1], [0, 0, 1, 1], [], []>} : vector<64x128xf32>, vector<128x24xf32>, vector<64x24xf32> -> vector<64x24xf32>
    %c0_14 = arith.constant 0 : index
    %c0_15 = arith.constant 0 : index
    %35 = vector.load %arg5[%c0_14, %c0_15] : memref<64x24xf32, #tpu.memory_space<vmem>>, vector<64x24xf32>
    %36 = arith.addf %34, %35 : vector<64x24xf32>
    %37 = vector.extract_strided_slice %36 {offsets = [0, 0], sizes = [64, 8], strides = [1, 1]} : vector<64x24xf32> to vector<64x8xf32>
    %38 = vector.extract_strided_slice %36 {offsets = [0, 8], sizes = [64, 8], strides = [1, 1]} : vector<64x24xf32> to vector<64x8xf32>
    %39 = vector.extract_strided_slice %36 {offsets = [0, 16], sizes = [64, 8], strides = [1, 1]} : vector<64x24xf32> to vector<64x8xf32>
    %cst_16 = arith.constant dense<0.000000e+00> : vector<64x64xf32>
    %40 = tpu.matmul %37, %38, %cst_16 {dimension_numbers = #tpu.dot_dimension_numbers<[1], [1], [0], [0], [0, 0, 1, 0], [], []>} : vector<64x8xf32>, vector<64x8xf32>, vector<64x64xf32> -> vector<64x64xf32>
    %cst_17 = arith.constant 0.353553385 : f32
    %41 = vector.broadcast %cst_17 : f32 to vector<64x64xf32>
    %42 = arith.mulf %40, %41 : vector<64x64xf32>
    %c0_18 = arith.constant 0 : index
    %c0_19 = arith.constant 0 : index
    %43 = vector.load %arg1[%c0_18, %c0_19] : memref<64x64xf32, #tpu.memory_space<vmem>>, vector<64x64xf32>
    %44 = arith.addf %42, %43 : vector<64x64xf32>
    %cst_20 = arith.constant dense<0xFF800000> : vector<64xf32>
    %45 = vector.multi_reduction <maximumf>, %44, %cst_20 [1] : vector<64x64xf32> to vector<64xf32>
    %46 = vector.shape_cast %45 : vector<64xf32> to vector<64x1xf32>
    %47 = vector.broadcast %46 : vector<64x1xf32> to vector<64x64xf32>
    %48 = arith.subf %44, %47 : vector<64x64xf32>
    %49 = math.exp %48 : vector<64x64xf32>
    %cst_21 = arith.constant dense<0.000000e+00> : vector<64xf32>
    %50 = vector.multi_reduction <add>, %49, %cst_21 [1] : vector<64x64xf32> to vector<64xf32>
    %51 = vector.shape_cast %50 : vector<64xf32> to vector<64x1xf32>
    %52 = tpu.reciprocal %51 {approx = true} : vector<64x1xf32> -> vector<64x1xf32>
    %53 = vector.broadcast %52 : vector<64x1xf32> to vector<64x64xf32>
    %54 = arith.mulf %49, %53 : vector<64x64xf32>
    %cst_22 = arith.constant dense<0.000000e+00> : vector<64x8xf32>
    %55 = tpu.matmul %54, %39, %cst_22 {dimension_numbers = #tpu.dot_dimension_numbers<[1], [0], [0], [1], [0, 0, 1, 1], [], []>} : vector<64x64xf32>, vector<64x8xf32>, vector<64x8xf32> -> vector<64x8xf32>
    %56 = tpu.concatenate %55, %55, %55, %55 in 1 : vector<64x8xf32>, vector<64x8xf32>, vector<64x8xf32>, vector<64x8xf32> -> vector<64x32xf32>
    %c0_23 = arith.constant 0 : index
    %c0_24 = arith.constant 0 : index
    %57 = vector.load %arg3[%c0_23, %c0_24] : memref<64x32xf32, #tpu.memory_space<vmem>>, vector<64x32xf32>
    %58 = arith.mulf %56, %57 : vector<64x32xf32>
    %c0_25 = arith.constant 0 : index
    %c0_26 = arith.constant 0 : index
    %59 = vector.load %arg6[%c0_25, %c0_26] : memref<32x32xf32, #tpu.memory_space<vmem>>, vector<32x32xf32>
    %cst_27 = arith.constant dense<0.000000e+00> : vector<64x32xf32>
    %60 = tpu.matmul %58, %59, %cst_27 {dimension_numbers = #tpu.dot_dimension_numbers<[1], [0], [0], [1], [0, 0, 1, 1], [], []>} : vector<64x32xf32>, vector<32x32xf32>, vector<64x32xf32> -> vector<64x32xf32>
    %c0_28 = arith.constant 0 : index
    %c0_29 = arith.constant 0 : index
    %61 = vector.load %arg7[%c0_28, %c0_29] : memref<1x32xf32, #tpu.memory_space<vmem>>, vector<1x32xf32>
    %62 = vector.extract_strided_slice %60 {offsets = [0, 0], sizes = [16, 32], strides = [1, 1]} : vector<64x32xf32> to vector<16x32xf32>
    %63 = vector.broadcast %61 : vector<1x32xf32> to vector<16x32xf32>
    %64 = arith.addf %63, %62 : vector<16x32xf32>
    %65 = vector.extract_strided_slice %60 {offsets = [16, 0], sizes = [16, 32], strides = [1, 1]} : vector<64x32xf32> to vector<16x32xf32>
    %66 = arith.addf %64, %65 : vector<16x32xf32>
    %67 = vector.extract_strided_slice %60 {offsets = [32, 0], sizes = [16, 32], strides = [1, 1]} : vector<64x32xf32> to vector<16x32xf32>
    %68 = arith.addf %66, %67 : vector<16x32xf32>
    %69 = vector.extract_strided_slice %60 {offsets = [48, 0], sizes = [16, 32], strides = [1, 1]} : vector<64x32xf32> to vector<16x32xf32>
    %70 = arith.addf %68, %69 : vector<16x32xf32>
    %71 = arith.addf %0, %70 : vector<16x32xf32>
    %c1 = arith.constant 1 : index
    %c0_30 = arith.constant 0 : index
    %72 = vector.load %arg12[%c1, %c0_30] : memref<2x32xf32, #tpu.memory_space<vmem>>, vector<1x32xf32>
    %73 = vector.shape_cast %72 : vector<1x32xf32> to vector<32xf32>
    %c1_31 = arith.constant 1 : index
    %c0_32 = arith.constant 0 : index
    %74 = vector.load %arg13[%c1_31, %c0_32] : memref<2x32xf32, #tpu.memory_space<vmem>>, vector<1x32xf32>
    %75 = vector.shape_cast %74 : vector<1x32xf32> to vector<32xf32>
    %cst_33 = arith.constant dense<0.000000e+00> : vector<16xf32>
    %76 = vector.multi_reduction <add>, %71, %cst_33 [1] : vector<16x32xf32> to vector<16xf32>
    %77 = vector.shape_cast %76 : vector<16xf32> to vector<16x1xf32>
    %cst_34 = arith.constant 3.200000e+01 : f32
    %78 = vector.broadcast %cst_34 : f32 to vector<16x1xf32>
    %79 = arith.divf %77, %78 : vector<16x1xf32>
    %80 = vector.broadcast %79 : vector<16x1xf32> to vector<16x32xf32>
    %81 = arith.subf %71, %80 : vector<16x32xf32>
    %82 = arith.mulf %81, %81 : vector<16x32xf32>
    %cst_35 = arith.constant dense<0.000000e+00> : vector<16xf32>
    %83 = vector.multi_reduction <add>, %82, %cst_35 [1] : vector<16x32xf32> to vector<16xf32>
    %84 = vector.shape_cast %83 : vector<16xf32> to vector<16x1xf32>
    %cst_36 = arith.constant 3.100000e+01 : f32
    %85 = vector.broadcast %cst_36 : f32 to vector<16x1xf32>
    %86 = arith.divf %84, %85 : vector<16x1xf32>
    %87 = vector.broadcast %79 : vector<16x1xf32> to vector<16x32xf32>
    %88 = arith.subf %71, %87 : vector<16x32xf32>
    %89 = vector.shape_cast %73 : vector<32xf32> to vector<1x32xf32>
    %90 = vector.broadcast %89 : vector<1x32xf32> to vector<16x32xf32>
    %91 = arith.mulf %90, %88 : vector<16x32xf32>
    %cst_37 = arith.constant 9.99999997E-7 : f32
    %92 = vector.broadcast %cst_37 : f32 to vector<16x1xf32>
    %93 = arith.addf %86, %92 : vector<16x1xf32>
    %94 = math.rsqrt %93 : vector<16x1xf32>
    %95 = vector.broadcast %94 : vector<16x1xf32> to vector<16x32xf32>
    %96 = arith.mulf %91, %95 : vector<16x32xf32>
    %97 = vector.shape_cast %75 : vector<32xf32> to vector<1x32xf32>
    %98 = vector.broadcast %97 : vector<1x32xf32> to vector<16x32xf32>
    %99 = arith.addf %96, %98 : vector<16x32xf32>
    %c0_38 = arith.constant 0 : index
    %c0_39 = arith.constant 0 : index
    %100 = vector.load %arg8[%c0_38, %c0_39] : memref<32x64xf32, #tpu.memory_space<vmem>>, vector<32x64xf32>
    %cst_40 = arith.constant dense<0.000000e+00> : vector<16x64xf32>
    %101 = tpu.matmul %99, %100, %cst_40 {dimension_numbers = #tpu.dot_dimension_numbers<[1], [0], [0], [1], [0, 0, 1, 1], [], []>} : vector<16x32xf32>, vector<32x64xf32>, vector<16x64xf32> -> vector<16x64xf32>
    %c0_41 = arith.constant 0 : index
    %c0_42 = arith.constant 0 : index
    %102 = vector.load %arg9[%c0_41, %c0_42] : memref<1x64xf32, #tpu.memory_space<vmem>>, vector<1x64xf32>
    %103 = vector.broadcast %102 : vector<1x64xf32> to vector<16x64xf32>
    %104 = arith.addf %101, %103 : vector<16x64xf32>
    %cst_43 = arith.constant 0.000000e+00 : f32
    %105 = vector.broadcast %cst_43 : f32 to vector<16x64xf32>
    %106 = arith.maximumf %104, %105 : vector<16x64xf32>
    %c0_44 = arith.constant 0 : index
    %c0_45 = arith.constant 0 : index
    %107 = vector.load %arg10[%c0_44, %c0_45] : memref<64x32xf32, #tpu.memory_space<vmem>>, vector<64x32xf32>
    %cst_46 = arith.constant dense<0.000000e+00> : vector<16x32xf32>
    %108 = tpu.matmul %106, %107, %cst_46 {dimension_numbers = #tpu.dot_dimension_numbers<[1], [0], [0], [1], [0, 0, 1, 1], [], []>} : vector<16x64xf32>, vector<64x32xf32>, vector<16x32xf32> -> vector<16x32xf32>
    %109 = arith.addf %71, %108 : vector<16x32xf32>
    %c0_47 = arith.constant 0 : index
    %c0_48 = arith.constant 0 : index
    %110 = vector.load %arg11[%c0_47, %c0_48] : memref<1x32xf32, #tpu.memory_space<vmem>>, vector<1x32xf32>
    %111 = vector.broadcast %110 : vector<1x32xf32> to vector<16x32xf32>
    %112 = arith.addf %109, %111 : vector<16x32xf32>
    %c0_49 = arith.constant 0 : index
    %c0_50 = arith.constant 0 : index
    %113 = vector.load %arg14[%c0_49, %c0_50] : memref<16x32xf32, #tpu.memory_space<vmem>>, vector<16x32xf32>
    tpu.vector_store %arg14[%c0_49, %c0_50], %112 {strides = array<i32>} : memref<16x32xf32, #tpu.memory_space<vmem>>, vector<16x32xf32>,
    return
  }
}

</mosaic_0001>

<bundles_post_ra>
// kernel: tpu_custom_call.1
= control target key start
LH: loop header
LB: loop body
LE: loop exit
PB: predicated region body
PF: predicated region fallthrough
CT: control target
= control target key end

     0   :  { %vm52_vm0 = vcmask 261120   ;;  %s2075_s0 = inlined_call_operand.vmem [shape: f32[16,32], index: 0, kind: input, shape index: {}]   ;;  %s2076_s1 = inlined_call_operand.vmem [shape: f32[64,64], index: 1, kind: input, shape index: {}]   ;;  %s2077_s2 = inlined_call_operand.vmem [shape: f32[64,128], index: 2, kind: input, shape index: {}]   ;;  %s2078_s3 = inlined_call_operand.vmem [shape: f32[64,32], index: 3, kind: input, shape index: {}]   ;;  %s2079_s4 = inlined_call_operand.vmem [shape: f32[128,24], index: 4, kind: input, shape index: {}]   ;;  %s2080_s5 = inlined_call_operand.vmem [shape: f32[64,24], index: 5, kind: input, shape index: {}]   ;;  %s2081_s6 = inlined_call_operand.vmem [shape: f32[32,32], index: 6, kind: input, shape index: {}]   ;;  %s2082_s7 = inlined_call_operand.vmem [shape: f32[1,32], index: 7, kind: input, shape index: {}]   ;;  %s2083_s8 = inlined_call_operand.vmem [shape: f32[32,64], index: 8, kind: input, shape index: {}]   ;;  %s2084_s9 = inlined_call_operand.vmem [shape: f32[1,64], index: 9, kind: input, shape index: {}]   ;;  %s2085_s10 = inlined_call_operand.vmem [shape: f32[64,32], index: 10, kind: input, shape index: {}]   ;;  %s2086_s11 = inlined_call_operand.vmem [shape: f32[1,32], index: 11, kind: input, shape index: {}]   ;;  %s2087_s12 = inlined_call_operand.vmem [shape: f32[2,32], index: 12, kind: input, shape index: {}]   ;;  %s2088_s13 = inlined_call_operand.vmem [shape: f32[2,32], index: 13, kind: input, shape index: {}]   ;;  %s2089_s14 = inlined_call_operand.hbm [shape: f32[16,32], index: 14, kind: output, shape index: {}]  }
   0x1   :  { %v48_v0 = vld [vmem:[%s2075_s0] sm:$0xff]  ;;  %v1658_v1 = vld [vmem:[%s2075_s0 + $0x8] sm:$0xff] }
   0x2   :  { %v53_v2 = vsel %vm52_vm0, %v48_v0, 0.0 }
   0x3   :  { %19 = vsyncpa [#allocation3], 0  ;;  %54 = vadd.xlane.f32.xlu0 %v53_v2  ;;  %v56_v3 = vsel %vm52_vm0, %v1658_v1, 0.0  ;;  %v152_v14 = vld [vmem:[%s2079_s4 + $0x78] sm:$0xff]  ;;  %v151_v15 = vld [vmem:[%s2079_s4 + $0x70] sm:$0xff]  ;;  %s1567_s19 = smov 32  }
   0x4   :  { %1344 = vmatprep.subr.mxu0 %v152_v14  ;;  %v150_v16 = vld [vmem:[%s2079_s4 + $0x68] sm:$0xff]  ;;  %v149_v17 = vld [vmem:[%s2079_s4 + $0x60] sm:$0xff]  ;;  %v148_v18 = vld [vmem:[%s2079_s4 + $0x58] sm:$0xff]  ;;  %s1568_s22 = smov 96   ;;  %s1569_s23 = smov 64   ;;  %vm115_vm1 = vcmask 523264  }
   0x5   :  { %1345 = vmatpush3.msra.mxu0 %v152_v14  ;;  %v147_v19 = vld [vmem:[%s2079_s4 + $0x50] sm:$0xff]  ;;  %v146_v20 = vld [vmem:[%s2079_s4 + $0x48] sm:$0xff]  ;;  %v145_v27 = vld [vmem:[%s2079_s4 + $0x40] sm:$0xff]  ;;  %vm118_vm2 = vcmask 785408   ;;  %vm290_vm3 = vcmask 64512   ;;  %s1570_s29 = smov 120  }
   0x6   :  { %1346 = vmatprep.subr.mxu0 %v151_v15  ;;  %v144_v28 = vld [vmem:[%s2079_s4 + $0x38] sm:$0xff]  ;;  %v1217_v29 = vld [vmem:[%s2087_s12] ss:$0 sm:$0xff]  ;;  %v143_v30 = vld [vmem:[%s2079_s4 + $0x30] sm:$0xff]  ;;  %s1572_s25 = smov 8   ;;  %s1574_s26 = smov 24  }
   0x7   :  { %57 = vadd.xlane.f32.xlu0 %v56_v3  ;;  %1347 = vmatpush3.msra.mxu0 %v151_v15  ;;  %v142_v31 = vld [vmem:[%s2079_s4 + $0x28] sm:$0xff]  ;;  %v1218_v34 = vld [vmem:[%s2088_s13] ss:$0 sm:$0xff]  ;;  %v140_v36 = vld [vmem:[%s2079_s4 + $0x18] sm:$0xff]  ;;  %vm781_vm4 = vcmask 130048   ;;  %vm790_vm5 = vcmask 195584  }
   0x8   :  { %1348 = vmatprep.subr.mxu0 %v150_v16  ;;  %v141_v35 = vld [vmem:[%s2079_s4 + $0x20] sm:$0xff]  ;;  %v139_v41 = vld [vmem:[%s2079_s4 + $0x10] sm:$0xff]  ;;  %v138_v42 = vld [vmem:[%s2079_s4 + $0x8] sm:$0xff] }
   0x9   :  { %1349 = vmatpush3.msra.mxu0 %v150_v16  ;;  %v137_v45 = vld [vmem:[%s2079_s4] sm:$0xff]  ;;  %v122_v57 = vld [vmem:[%s2077_s2 + $0x8] sm:$0xff]  ;;  %v123_v60 = vld [vmem:[%s2077_s2 + $0x10] sm:$0xff]  ;;  %s1573_s4 = smov 16  }
   0xa   :  { %1350 = vmatprep.subr.mxu0 %v149_v17  ;;  %v121_v50 = vld [vmem:[%s2077_s2] sm:$0xff] }
   0xb   :  { %1351 = vmatpush3.msra.mxu0 %v149_v17  ;;  %v125_v2 = vld [vmem:[%s2077_s2 + $0x20] sm:$0xff] }
   0xc   :  { %1352 = vmatprep.subr.mxu0 %v148_v18 }
   0xd   :  { %1353 = vmatpush3.msra.mxu0 %v148_v18 }
   0xe   :  { %1354 = vmatprep.subr.mxu0 %v147_v19 }
   0xf   :  { %1355 = vmatpush3.msra.mxu0 %v147_v19  ;;  %v160_v19 = vld [vmem:[%s2080_s5 + $0x38] sm:$0xff] }
  0x10   :  { %1356 = vmatprep.subr.mxu0 %v146_v20 }
  0x11   :  { %1357 = vmatpush3.msra.mxu0 %v146_v20 }
  0x12   :  { %1358 = vmatprep.subr.mxu0 %v145_v27 }
  0x13   :  { %1359 = vmatpush3.msra.mxu0 %v145_v27 }
  0x14   :  { %1360 = vmatprep.subr.mxu0 %v144_v28 }
  0x15   :  { %1361 = vmatpush3.msra.mxu0 %v144_v28  ;;  %v156_v28 = vld [vmem:[%s2080_s5 + $0x18] sm:$0xff] }
  0x16   :  { %1362 = vmatprep.subr.mxu0 %v143_v30 }
  0x17   :  { %1363 = vmatpush3.msra.mxu0 %v143_v30  ;;  %v155_v30 = vld [vmem:[%s2080_s5 + $0x10] sm:$0xff] }
  0x18   :  { %1364 = vmatprep.subr.mxu0 %v142_v31 }
  0x19   :  { %1365 = vmatpush3.msra.mxu0 %v142_v31 }
  0x1a   :  { %1366 = vmatprep.subr.mxu0 %v141_v35 }
  0x1b   :  { %1367 = vmatpush3.msra.mxu0 %v141_v35 }
  0x1c   :  { %1368 = vmatprep.subr.mxu0 %v140_v36 }
  0x1d   :  { %1369 = vmatpush3.msra.mxu0 %v140_v36 }
  0x1e   :  { %1370 = vmatprep.subr.mxu0 %v139_v41 }
  0x1f   :  { %1371 = vmatpush3.msra.mxu0 %v139_v41 }
  0x20   :  { %1372 = vmatprep.subr.mxu0 %v138_v42 }
  0x21   :  { %1373 = vmatpush3.msra.mxu0 %v138_v42 }
  0x22   :  { %1374 = vmatprep.subr.mxu0 %v137_v45 }
  0x23   :  { %1375 = vmatpush3.msra.mxu0 %v137_v45 }
  0x8c   :  { %v55_v4 = vpop.xlane.xlu0 %54 }
  0x8d   :  { %v60_v5 = vmul.f32 0.03125, %v55_v4 }
  0x8f   :  { %v62_v6 = vsub.f32 %v48_v0, %v60_v5  ;;  %v124_v0 = vld [vmem:[%s2077_s2 + $0x18] sm:$0xff]  ;;  %v126_v5 = vld [vmem:[%s2077_s2 + $0x28] sm:$0xff] }
  0x90   :  { %v58_v7 = vpop.xlane.xlu0 %57 }
  0x91   :  { %v61_v8 = vmul.f32 0.03125, %v58_v7  ;;  %v64_v9 = vmul.f32 %v62_v6, %v62_v6  ;;  %v79_v32 = vmul.f32 %v1217_v29, %v62_v6  ;;  %v127_v6 = vld [vmem:[%s2077_s2 + $0x30] sm:$0xff] }
  0x93   :  { %v63_v10 = vsub.f32 %v1658_v1, %v61_v8  ;;  %v66_v11 = vsel %vm52_vm0, %v64_v9, 0.0  ;;  %v128_v9 = vld [vmem:[%s2077_s2 + $0x38] sm:$0xff] }
  0x94   :  { %67 = vadd.xlane.f32.xlu1 %v66_v11 }
  0x95   :  { %v65_v12 = vmul.f32 %v63_v10, %v63_v10  ;;  %v80_v38 = vmul.f32 %v1217_v29, %v63_v10 }
  0x97   :  { %v69_v13 = vsel %vm52_vm0, %v65_v12, 0.0  ;;  %v153_v12 = vld [vmem:[%s2080_s5] sm:$0xff] }
  0x98   :  { %70 = vadd.xlane.f32.xlu1 %v69_v13 }
 0x11d   :  { %v68_v21 = vpop.xlane.xlu1 %67 }
 0x11e   :  { %v73_v22 = vmul.f32 0.032258064, %v68_v21  ;;  %v159_v21 = vld [vmem:[%s2080_s5 + $0x30] sm:$0xff] }
 0x120   :  { %v81_v23 = vadd.f32 1e-06, %v73_v22 }
 0x121   :  { %v71_v24 = vpop.xlane.xlu1 %70 }
 0x122   :  { %1504 = vrsqrt.f32 %v81_v23  ;;  %v74_v25 = vmul.f32 0.032258064, %v71_v24  ;;  %v158_v23 = vld [vmem:[%s2080_s5 + $0x28] sm:$0xff] }
 0x124   :  { %v82_v26 = vadd.f32 1e-06, %v74_v25 }
 0x126   :  { %1506 = vrsqrt.f32 %v82_v26  ;;  %v157_v26 = vld [vmem:[%s2080_s5 + $0x20] sm:$0xff] }
 0x12f   :  { %v1505_v33 = vpop.eup %1504 }
 0x130   :  { %v85_v37 = vmul.f32 %v1505_v33, %v79_v32  ;;  %v154_v32 = vld [vmem:[%s2080_s5 + $0x8] sm:$0xff] }
 0x132   :  { %v91_v39 = vadd.f32 %v1218_v34, %v85_v37 }
 0x133   :  { %v1507_v40 = vpop.eup %1506 }
 0x134   :  { %95 = vrot.lane.b32.xlu0 %v91_v39, %s1567_s19  ;;  %v86_v43 = vmul.f32 %v1507_v40, %v80_v38 }
 0x136   :  { %v92_v44 = vadd.f32 %v1218_v34, %v86_v43 }
 0x138   :  { %107 = vrot.lane.b32.xlu0 %v91_v39, %s1568_s22  ;;  %97 = vrot.lane.b32.xlu1 %v92_v44, %s1567_s19  ;;  %s1571_s19 = smov 112  }
 0x13c   :  { %101 = vrot.lane.b32.xlu1 %v91_v39, %s1569_s23 }
 0x140   :  { %103 = vrot.lane.b32.xlu1 %v92_v44, %s1569_s23 }
 0x144   :  { %109 = vrot.lane.b32.xlu1 %v92_v44, %s1568_s22 }
 0x1a6   :  { %v96_v46 = vpop.permute.xlu0 %95 }
 0x1a7   :  { %v113_v48 = vsel %vm52_vm0, %v91_v39, %v96_v46 }
 0x1aa   :  { %v98_v47 = vpop.permute.xlu1 %97  ;;  %v108_v51 = vpop.permute.xlu0 %107 }
 0x1ab   :  { %v114_v56 = vsel %vm52_vm0, %v92_v44, %v98_v47  ;;  %v437_v44 = vld [vmem:[%s2076_s1 + $0x8] sm:$0xff]  ;;  %v436_v47 = vld [vmem:[%s2076_s1] sm:$0xff] }
 0x1ae   :  { %v102_v49 = vpop.permute.xlu1 %101 }
 0x1af   :  { %v116_v52 = vsel %vm115_vm1, %v113_v48, %v102_v49 }
 0x1b0   :  { %v119_v53 = vsel %vm118_vm2, %v116_v52, %v108_v51  ;;  %v439_v51 = vld [vmem:[%s2076_s1 + $0x18] sm:$0xff] }
 0x1b1   :  { %v129_v54 = vmul.f32 %v121_v50, %v119_v53  ;;  %v131_v63 = vmul.f32 %v123_v60, %v119_v53  ;;  %v133_v4 = vmul.f32 %v125_v2, %v119_v53  ;;  %v135_v8 = vmul.f32 %v127_v6, %v119_v53  ;;  %v441_v60 = vld [vmem:[%s2076_s1 + $0x28] sm:$0xff]  ;;  %v443_v6 = vld [vmem:[%s2076_s1 + $0x38] sm:$0xff] }
 0x1b2   :  { %v104_v55 = vpop.permute.xlu1 %103 }
 0x1b3   :  { %1376 = vmatprep.mubr.f32.mxu0 %v129_v54  ;;  %v117_v58 = vsel %vm115_vm1, %v114_v56, %v104_v55 }
 0x1b6   :  { %v110_v59 = vpop.permute.xlu1 %109 }
 0x1b7   :  { %v120_v61 = vsel %vm118_vm2, %v117_v58, %v110_v59 }
 0x1b8   :  { %v130_v62 = vmul.f32 %v122_v57, %v120_v61  ;;  %v132_v3 = vmul.f32 %v124_v0, %v120_v61  ;;  %v134_v7 = vmul.f32 %v126_v5, %v120_v61  ;;  %v136_v10 = vmul.f32 %v128_v9, %v120_v61  ;;  %v438_v61 = vld [vmem:[%s2076_s1 + $0x10] sm:$0xff] }
 0x1ba   :  { %1377 = vmatmul.mubr.f32.vlgmr.msra.gmra.mxu0 %v130_v62 }
 0x1bb   :  { %1379 = vmatprep.mubr.f32.mxu0 %v131_v63 }
 0x1be   :  { %1380 = vmatmul.mubr.f32.gmra.mxu0 %v132_v3 }
 0x1bf   :  { %1382 = vmatprep.mubr.f32.mxu0 %v133_v4 }
 0x1c2   :  { %1383 = vmatmul.mubr.f32.gmra.mxu0 %v134_v7  ;;  %v440_v7 = vld [vmem:[%s2076_s1 + $0x20] sm:$0xff] }
 0x1c3   :  { %1385 = vmatprep.mubr.f32.mxu0 %v135_v8 }
 0x1c6   :  { %1386 = vmatmul.mubr.f32.gmra.mxu0 %v136_v10 }
 0x27a   :  { %v1378_v11 = vpop.f32.mrf.mxu0 }
 0x27b   :  { %v1793_v34 = vadd.f32 %v1378_v11, %v154_v32 }
 0x27c   :  { %v227_v13 = vpop.f32.mrf.mxu0 }
 0x27d   :  { %v1751_v14 = vadd.f32 %v227_v13, %v153_v12 }
 0x27e   :  { %v1381_v15 = vpop.f32.mrf.mxu0 }
 0x27f   :  { %1404 = vmatprep.mubr.msk.f32.mxu1 %vm290_vm3, %v1751_v14  ;;  %v1784_v31 = vadd.f32 %v1381_v15, %v156_v28 }
 0x280   :  { %v237_v16 = vpop.f32.mrf.mxu0 }
 0x281   :  { %v1790_v33 = vadd.f32 %v237_v16, %v155_v30  ;;  %v442_v16 = vld [vmem:[%s2076_s1 + $0x30] sm:$0xff] }
 0x282   :  { %v1384_v17 = vpop.f32.mrf.mxu0 }
 0x283   :  { %v1772_v27 = vadd.f32 %v1384_v17, %v158_v23 }
 0x284   :  { %v247_v18 = vpop.f32.mrf.mxu0 }
 0x285   :  { %v1778_v29 = vadd.f32 %v247_v18, %v157_v26 }
 0x286   :  { %v1387_v20 = vpop.f32.mrf.mxu0 }
 0x287   :  { %v1761_v22 = vadd.f32 %v1387_v20, %v160_v19 }
 0x288   :  { %v257_v24 = vpop.f32.mrf.mxu0 }
 0x289   :  { %v1766_v25 = vadd.f32 %v257_v24, %v159_v21  ;;  %288 = vrot.lane.b32.xlu0 %v1761_v22, %s1570_s29 }
 0x28b   :  { %286 = vrot.lane.b32.xlu1 %v1766_v25, %s1570_s29 }
 0x28d   :  { %284 = vrot.lane.b32.xlu0 %v1772_v27, %s1570_s29 }
 0x28f   :  { %282 = vrot.lane.b32.xlu1 %v1778_v29, %s1570_s29 }
 0x291   :  { %280 = vrot.lane.b32.xlu0 %v1784_v31, %s1570_s29 }
 0x293   :  { %278 = vrot.lane.b32.xlu1 %v1790_v33, %s1570_s29 }
 0x295   :  { %276 = vrot.lane.b32.xlu0 %v1793_v34, %s1570_s29 }
 0x297   :  { %274 = vrot.lane.b32.xlu1 %v1751_v14, %s1570_s29 }
 0x2fb   :  { %v289_v35 = vpop.permute.xlu0 %288 }
 0x2fc   :  { %1388 = vmatprep.subr.msk.mxu1 %vm290_vm3, %v289_v35 }
 0x2fd   :  { %1389 = vmatpush3.xpose.msk.msra.mxu1 %vm290_vm3, %v289_v35  ;;  %v287_v36 = vpop.permute.xlu1 %286 }
 0x2fe   :  { %1390 = vmatprep.subr.msk.mxu1 %vm290_vm3, %v287_v36 }
 0x2ff   :  { %v285_v37 = vpop.permute.xlu0 %284 }
 0x301   :  { %1391 = vmatpush3.xpose.msk.msra.mxu1 %vm290_vm3, %v287_v36  ;;  %v283_v38 = vpop.permute.xlu1 %282 }
 0x302   :  { %1392 = vmatprep.subr.msk.mxu1 %vm290_vm3, %v285_v37 }
 0x303   :  { %v281_v39 = vpop.permute.xlu0 %280 }
 0x305   :  { %1393 = vmatpush3.xpose.msk.msra.mxu1 %vm290_vm3, %v285_v37  ;;  %v279_v40 = vpop.permute.xlu1 %278 }
 0x306   :  { %1394 = vmatprep.subr.msk.mxu1 %vm290_vm3, %v283_v38 }
 0x307   :  { %v277_v41 = vpop.permute.xlu0 %276 }
 0x309   :  { %1395 = vmatpush3.xpose.msk.msra.mxu1 %vm290_vm3, %v283_v38  ;;  %v275_v42 = vpop.permute.xlu1 %274 }
 0x30a   :  { %1396 = vmatprep.subr.msk.mxu1 %vm290_vm3, %v281_v39 }
 0x30d   :  { %1397 = vmatpush3.xpose.msk.msra.mxu1 %vm290_vm3, %v281_v39 }
 0x30e   :  { %1398 = vmatprep.subr.msk.mxu1 %vm290_vm3, %v279_v40 }
 0x311   :  { %1399 = vmatpush3.xpose.msk.msra.mxu1 %vm290_vm3, %v279_v40 }
 0x312   :  { %1400 = vmatprep.subr.msk.mxu1 %vm290_vm3, %v277_v41 }
 0x315   :  { %1401 = vmatpush3.xpose.msk.msra.mxu1 %vm290_vm3, %v277_v41 }
 0x316   :  { %1402 = vmatprep.subr.msk.mxu1 %vm290_vm3, %v275_v42 }
 0x319   :  { %1403 = vmatpush3.xpose.msk.msra.mxu1 %vm290_vm3, %v275_v42 }
 0x31c   :  { %1405 = vmatmul.mubr.msk.f32.vlgmr.msra.gmra.mxu1 %vm290_vm3, %v1793_v34 }
 0x31d   :  { %1407 = vmatprep.mubr.msk.f32.mxu1 %vm290_vm3, %v1790_v33 }
 0x320   :  { %1408 = vmatmul.mubr.msk.f32.gmra.mxu1 %vm290_vm3, %v1784_v31 }
 0x321   :  { %1410 = vmatprep.mubr.msk.f32.mxu1 %vm290_vm3, %v1778_v29 }
 0x324   :  { %1411 = vmatmul.mubr.msk.f32.gmra.mxu1 %vm290_vm3, %v1772_v27 }
 0x325   :  { %1413 = vmatprep.mubr.msk.f32.mxu1 %vm290_vm3, %v1766_v25 }
 0x328   :  { %1414 = vmatmul.mubr.msk.f32.gmra.mxu1 %vm290_vm3, %v1761_v22 }
 0x3dc   :  { %v1406_v43 = vpop.f32.mrf.mxu1 }
 0x3dd   :  { %v429_v45 = vmul.f32 0.35355338, %v1406_v43 }
 0x3de   :  { %v389_v46 = vpop.f32.mrf.mxu1 }
 0x3df   :  { %v428_v48 = vmul.f32 0.35355338, %v389_v46  ;;  %v445_v49 = vadd.f32 %v437_v44, %v429_v45 }
 0x3e0   :  { %v1409_v50 = vpop.f32.mrf.mxu1 }
 0x3e1   :  { %v431_v52 = vmul.f32 0.35355338, %v1409_v50  ;;  %v455_v53 = vsel %vm115_vm1, %v445_v49, -inf  ;;  %v444_v54 = vadd.f32 %v436_v47, %v428_v48 }
 0x3e2   :  { %456 = vmax.xlane.f32.xlu1 %v455_v53  ;;  %v399_v55 = vpop.f32.mrf.mxu1 }
 0x3e3   :  { %v430_v56 = vmul.f32 0.35355338, %v399_v55  ;;  %v452_v57 = vsel %vm115_vm1, %v444_v54, -inf  ;;  %v447_v58 = vadd.f32 %v439_v51, %v431_v52 }
 0x3e4   :  { %453 = vmax.xlane.f32.xlu0 %v452_v57  ;;  %v1412_v59 = vpop.f32.mrf.mxu1 }
 0x3e5   :  { %v433_v62 = vmul.f32 0.35355338, %v1412_v59  ;;  %v461_v2 = vsel %vm115_vm1, %v447_v58, -inf  ;;  %v446_v4 = vadd.f32 %v438_v61, %v430_v56 }
 0x3e6   :  { %v409_v63 = vpop.f32.mrf.mxu1 }
 0x3e7   :  { %v432_v0 = vmul.f32 0.35355338, %v409_v63  ;;  %v449_v3 = vadd.f32 %v441_v60, %v433_v62  ;;  %v458_v12 = vsel %vm115_vm1, %v446_v4, -inf }
 0x3e8   :  { %462 = vmax.xlane.f32.xlu0 %v461_v2  ;;  %v1415_v5 = vpop.f32.mrf.mxu1 }
 0x3e9   :  { %v435_v8 = vmul.f32 0.35355338, %v1415_v5  ;;  %v467_v9 = vsel %vm115_vm1, %v449_v3, -inf  ;;  %v448_v15 = vadd.f32 %v440_v7, %v432_v0 }
 0x3ea   :  { %468 = vmax.xlane.f32.xlu1 %v467_v9  ;;  %v419_v10 = vpop.f32.mrf.mxu1 }
 0x3eb   :  { %v434_v11 = vmul.f32 0.35355338, %v419_v10  ;;  %v451_v13 = vadd.f32 %v443_v6, %v435_v8  ;;  %v464_v18 = vsel %vm115_vm1, %v448_v15, -inf }
 0x3ec   :  { %459 = vmax.xlane.f32.xlu0 %v458_v12 }
 0x3ed   :  { %v473_v17 = vsel %vm115_vm1, %v451_v13, -inf  ;;  %v450_v19 = vadd.f32 %v442_v16, %v434_v11 }
 0x3ee   :  { %474 = vmax.xlane.f32.xlu1 %v473_v17 }
 0x3ef   :  { %v470_v20 = vsel %vm115_vm1, %v450_v19, -inf }
 0x3f0   :  { %465 = vmax.xlane.f32.xlu0 %v464_v18 }
 0x3f4   :  { %471 = vmax.xlane.f32.xlu0 %v470_v20 }
 0x3ff   :  { %552 = vrot.lane.b32.xlu1 %v1766_v25, %s1571_s19 }
 0x403   :  { %550 = vrot.lane.b32.xlu1 %v1772_v27, %s1571_s19 }
 0x407   :  { %548 = vrot.lane.b32.xlu1 %v1778_v29, %s1571_s19 }
 0x40a   :  { %554 = vrot.lane.b32.xlu0 %v1761_v22, %s1571_s19 }
 0x40b   :  { %544 = vrot.lane.b32.xlu1 %v1790_v33, %s1571_s19 }
 0x40e   :  { %546 = vrot.lane.b32.xlu0 %v1784_v31, %s1571_s19 }
 0x46b   :  { %v457_v21 = vpop.xlane.xlu1 %456 }
 0x46c   :  { %v477_v23 = vsub.f32 %v445_v49, %v457_v21 }
 0x46d   :  { %v454_v24 = vpop.xlane.xlu0 %453 }
 0x46e   :  { %v486_v26 = vmul.f32 1.442695, %v477_v23  ;;  %v476_v25 = vsub.f32 %v444_v54, %v454_v24 }
 0x470   :  { %1508 = vpow2.f32 %v486_v26  ;;  %v484_v28 = vmul.f32 1.442695, %v476_v25 }
 0x471   :  { %v463_v27 = vpop.xlane.xlu0 %462 }
 0x472   :  { %1510 = vpow2.f32 %v484_v28  ;;  %v479_v30 = vsub.f32 %v447_v58, %v463_v27 }
 0x473   :  { %v469_v29 = vpop.xlane.xlu1 %468 }
 0x474   :  { %v490_v32 = vmul.f32 1.442695, %v479_v30  ;;  %v481_v35 = vsub.f32 %v449_v3, %v469_v29 }
 0x475   :  { %v460_v22 = vpop.xlane.xlu0 %459 }
 0x476   :  { %1512 = vpow2.f32 %v490_v32  ;;  %v494_v36 = vmul.f32 1.442695, %v481_v35  ;;  %v478_v33 = vsub.f32 %v446_v4, %v460_v22  ;;  %v818_v32 = vld [vmem:[%s2081_s6 + $0x18] sm:$0xff]  ;;  %v817_v35 = vld [vmem:[%s2081_s6 + $0x10] sm:$0xff]  ;;  %v816_v22 = vld [vmem:[%s2081_s6 + $0x8] sm:$0xff] }
 0x477   :  { %v475_v37 = vpop.xlane.xlu1 %474  ;;  %1444 = vmatprep.subr.mxu1 %v818_v32 }
 0x478   :  { %1514 = vpow2.f32 %v494_v36  ;;  %v488_v31 = vmul.f32 1.442695, %v478_v33  ;;  %v483_v38 = vsub.f32 %v451_v13, %v475_v37  ;;  %1445 = vmatpush3.msra.mxu1 %v818_v32  ;;  %v815_v36 = vld [vmem:[%s2081_s6] sm:$0xff] }
 0x479   :  { %v466_v39 = vpop.xlane.xlu0 %465  ;;  %1446 = vmatprep.subr.mxu1 %v817_v35 }
 0x47a   :  { %1516 = vpow2.f32 %v488_v31  ;;  %v498_v40 = vmul.f32 1.442695, %v483_v38  ;;  %v480_v41 = vsub.f32 %v448_v15, %v466_v39  ;;  %1447 = vmatpush3.msra.mxu1 %v817_v35 }
 0x47b   :  { %v553_v42 = vpop.permute.xlu1 %552  ;;  %1448 = vmatprep.subr.mxu1 %v816_v22 }
 0x47c   :  { %1518 = vpow2.f32 %v498_v40  ;;  %v492_v43 = vmul.f32 1.442695, %v480_v41  ;;  %1449 = vmatpush3.msra.mxu1 %v816_v22 }
 0x47d   :  { %v1872_v44 = vpop.eup %1508  ;;  %v472_v45 = vpop.xlane.xlu0 %471  ;;  %1450 = vmatprep.subr.mxu1 %v815_v36 }
 0x47e   :  { %1520 = vpow2.f32 %v492_v43  ;;  %v482_v46 = vsub.f32 %v450_v19, %v472_v45  ;;  %v503_v47 = vsel %vm115_vm1, %v1872_v44, 0.0  ;;  %1451 = vmatpush3.msra.mxu1 %v815_v36 }
 0x47f   :  { %v1511_v48 = vpop.eup %1510  ;;  %504 = vadd.xlane.f32.xlu1 %v503_v47  ;;  %v551_v50 = vpop.permute.xlu1 %550 }
 0x480   :  { %v496_v49 = vmul.f32 1.442695, %v482_v46  ;;  %v500_v51 = vsel %vm115_vm1, %v1511_v48, 0.0 }
 0x481   :  { %501 = vadd.xlane.f32.xlu0 %v500_v51  ;;  %v555_v52 = vpop.permute.xlu0 %554  ;;  %v799_v51 = vld [vmem:[%s2078_s3] sm:$0xff] }
 0x482   :  { %1522 = vpow2.f32 %v496_v49  ;;  %1416 = vmatprep.subr.mxu0 %v555_v52 }
 0x483   :  { %v1877_v53 = vpop.eup %1512  ;;  %1417 = vmatpush3.msra.mxu0 %v555_v52  ;;  %v549_v56 = vpop.permute.xlu1 %548 }
 0x484   :  { %1418 = vmatprep.subr.mxu0 %v553_v42  ;;  %v509_v54 = vsel %vm115_vm1, %v1877_v53, 0.0 }
 0x485   :  { %v1881_v55 = vpop.eup %1514  ;;  %510 = vadd.xlane.f32.xlu1 %v509_v54  ;;  %1419 = vmatpush3.msra.mxu0 %v553_v42  ;;  %v547_v61 = vpop.permute.xlu0 %546 }
 0x486   :  { %1420 = vmatprep.subr.mxu0 %v551_v50  ;;  %v515_v58 = vsel %vm115_vm1, %v1881_v55, 0.0 }
 0x487   :  { %v1517_v57 = vpop.eup %1516  ;;  %1421 = vmatpush3.msra.mxu0 %v551_v50  ;;  %v545_v63 = vpop.permute.xlu1 %544 }
 0x488   :  { %1422 = vmatprep.subr.mxu0 %v549_v56  ;;  %v506_v59 = vsel %vm115_vm1, %v1517_v57, 0.0 }
 0x489   :  { %v1886_v60 = vpop.eup %1518  ;;  %516 = vadd.xlane.f32.xlu1 %v515_v58  ;;  %507 = vadd.xlane.f32.xlu0 %v506_v59 }
 0x48a   :  { %1423 = vmatpush3.msra.mxu0 %v549_v56  ;;  %v521_v0 = vsel %vm115_vm1, %v1886_v60, 0.0 }
 0x48b   :  { %v1521_v62 = vpop.eup %1520  ;;  %1424 = vmatprep.subr.mxu0 %v547_v61 }
 0x48c   :  { %1425 = vmatpush3.msra.mxu0 %v547_v61  ;;  %v512_v2 = vsel %vm115_vm1, %v1521_v62, 0.0 }
 0x48d   :  { %1426 = vmatprep.subr.mxu0 %v545_v63  ;;  %522 = vadd.xlane.f32.xlu1 %v521_v0 }
 0x48e   :  { %513 = vadd.xlane.f32.xlu0 %v512_v2  ;;  %1427 = vmatpush3.msra.mxu0 %v545_v63 }
 0x48f   :  { %v1523_v3 = vpop.eup %1522 }
 0x490   :  { %v518_v4 = vsel %vm115_vm1, %v1523_v3, 0.0 }
 0x492   :  { %519 = vadd.xlane.f32.xlu0 %v518_v4  ;;  %v801_v4 = vld [vmem:[%s2078_s3 + $0x10] sm:$0xff] }
 0x49e   :  { %540 = vrot.lane.b32.xlu1 %v1751_v14, %s1571_s19 }
 0x4a8   :  { %542 = vrot.lane.b32.xlu0 %v1793_v34, %s1571_s19 }
 0x508   :  { %v505_v6 = vpop.xlane.xlu1 %504 }
 0x50a   :  { %v502_v5 = vpop.xlane.xlu0 %501 }
 0x50b   :  { %1524 = vrcp.f32 %v502_v5 }
 0x50c   :  { %1526 = vrcp.f32 %v505_v6  ;;  %v802_v6 = vld [vmem:[%s2078_s3 + $0x18] sm:$0xff] }
 0x50e   :  { %v511_v7 = vpop.xlane.xlu1 %510 }
 0x512   :  { %v508_v8 = vpop.xlane.xlu0 %507  ;;  %v517_v9 = vpop.xlane.xlu1 %516 }
 0x513   :  { %1528 = vrcp.f32 %v508_v8 }
 0x514   :  { %1530 = vrcp.f32 %v511_v7 }
 0x516   :  { %v523_v13 = vpop.xlane.xlu1 %522 }
 0x517   :  { %v514_v10 = vpop.xlane.xlu0 %513 }
 0x518   :  { %v1525_v11 = vpop.eup %1524  ;;  %1532 = vrcp.f32 %v514_v10 }
 0x519   :  { %v532_v12 = vmul.f32 %v1525_v11, %v1511_v48  ;;  %1534 = vrcp.f32 %v517_v9  ;;  %v1527_v14 = vpop.eup %1526 }
 0x51a   :  { %v541_v17 = vpop.permute.xlu1 %540  ;;  %v533_v18 = vmul.f32 %v1527_v14, %v1872_v44 }
 0x51b   :  { %v520_v15 = vpop.xlane.xlu0 %519  ;;  %1432 = vmatprep.mubr.msk.f32.mxu0 %vm115_vm1, %v532_v12 }
 0x51c   :  { %1536 = vrcp.f32 %v520_v15 }
 0x51d   :  { %1538 = vrcp.f32 %v523_v13 }
 0x51f   :  { %v543_v34 = vpop.permute.xlu0 %542 }
 0x520   :  { %1428 = vmatprep.subr.mxu0 %v543_v34  ;;  %v1529_v16 = vpop.eup %1528 }
 0x521   :  { %1429 = vmatpush3.msra.mxu0 %v543_v34  ;;  %v534_v19 = vmul.f32 %v1529_v16, %v1517_v57  ;;  %v1531_v20 = vpop.eup %1530 }
 0x522   :  { %1430 = vmatprep.subr.mxu0 %v541_v17  ;;  %v535_v23 = vmul.f32 %v1531_v20, %v1877_v53  ;;  %v800_v53 = vld [vmem:[%s2078_s3 + $0x8] sm:$0xff] }
 0x523   :  { %1431 = vmatpush3.msra.mxu0 %v541_v17 }
 0x524   :  { %1433 = vmatmul.mubr.msk.f32.vlgmr.msra.gmra.mxu0 %vm115_vm1, %v533_v18 }
 0x525   :  { %v1533_v21 = vpop.eup %1532  ;;  %1435 = vmatprep.mubr.msk.f32.mxu0 %vm115_vm1, %v534_v19  ;;  %v803_v19 = vld [vmem:[%s2078_s3 + $0x20] sm:$0xff] }
 0x526   :  { %v536_v24 = vmul.f32 %v1533_v21, %v1521_v62  ;;  %v1535_v26 = vpop.eup %1534  ;;  %v804_v21 = vld [vmem:[%s2078_s3 + $0x28] sm:$0xff] }
 0x527   :  { %v537_v28 = vmul.f32 %v1535_v26, %v1881_v55 }
 0x528   :  { %1436 = vmatmul.mubr.msk.f32.gmra.mxu0 %vm115_vm1, %v535_v23 }
 0x529   :  { %v1537_v25 = vpop.eup %1536  ;;  %1438 = vmatprep.mubr.msk.f32.mxu0 %vm115_vm1, %v536_v24 }
 0x52a   :  { %v538_v27 = vmul.f32 %v1537_v25, %v1523_v3  ;;  %v1539_v30 = vpop.eup %1538 }
 0x52b   :  { %v539_v29 = vmul.f32 %v1539_v30, %v1886_v60 }
 0x52c   :  { %1439 = vmatmul.mubr.msk.f32.gmra.mxu0 %vm115_vm1, %v537_v28 }
 0x52d   :  { %1441 = vmatprep.mubr.msk.f32.mxu0 %vm115_vm1, %v538_v27 }
 0x530   :  { %1442 = vmatmul.mubr.msk.f32.gmra.mxu0 %vm115_vm1, %v539_v29 }
 0x5e4   :  { %v1434_v33 = vpop.f32.mrf.mxu0 }
 0x5e5   :  { %703 = vrot.lane.b32.xlu1 %v1434_v33, %s1572_s25 }
 0x5e6   :  { %v654_v37 = vpop.f32.mrf.mxu0 }
 0x5e7   :  { %701 = vrot.lane.b32.xlu0 %v654_v37, %s1572_s25 }
 0x5e8   :  { %v1437_v31 = vpop.f32.mrf.mxu0 }
 0x5e9   :  { %727 = vrot.lane.b32.xlu1 %v1434_v33, %s1573_s4 }
 0x5ea   :  { %v664_v38 = vpop.f32.mrf.mxu0 }
 0x5eb   :  { %725 = vrot.lane.b32.xlu0 %v654_v37, %s1573_s4 }
 0x5ec   :  { %v1440_v39 = vpop.f32.mrf.mxu0 }
 0x5ed   :  { %751 = vrot.lane.b32.xlu1 %v1434_v33, %s1574_s26 }
 0x5ee   :  { %v674_v40 = vpop.f32.mrf.mxu0 }
 0x5ef   :  { %749 = vrot.lane.b32.xlu0 %v654_v37, %s1574_s26 }
 0x5f0   :  { %v1926_v41 = vpop.f32.mrf.mxu0 }
 0x5f1   :  { %707 = vrot.lane.b32.xlu1 %v1437_v31, %s1572_s25 }
 0x5f2   :  { %v1930_v42 = vpop.f32.mrf.mxu0 }
 0x5f3   :  { %705 = vrot.lane.b32.xlu0 %v664_v38, %s1572_s25 }
 0x5f5   :  { %731 = vrot.lane.b32.xlu1 %v1437_v31, %s1573_s4 }
 0x5f7   :  { %729 = vrot.lane.b32.xlu0 %v664_v38, %s1573_s4 }
 0x5f9   :  { %755 = vrot.lane.b32.xlu1 %v1437_v31, %s1574_s26 }
 0x5fb   :  { %753 = vrot.lane.b32.xlu0 %v664_v38, %s1574_s26 }
 0x5fd   :  { %711 = vrot.lane.b32.xlu1 %v1440_v39, %s1572_s25 }
 0x5ff   :  { %709 = vrot.lane.b32.xlu0 %v674_v40, %s1572_s25 }
 0x601   :  { %735 = vrot.lane.b32.xlu1 %v1440_v39, %s1573_s4 }
 0x603   :  { %733 = vrot.lane.b32.xlu0 %v674_v40, %s1573_s4 }
 0x605   :  { %759 = vrot.lane.b32.xlu1 %v1440_v39, %s1574_s26 }
 0x607   :  { %757 = vrot.lane.b32.xlu0 %v674_v40, %s1574_s26 }
 0x609   :  { %715 = vrot.lane.b32.xlu1 %v1926_v41, %s1572_s25 }
 0x60b   :  { %713 = vrot.lane.b32.xlu0 %v1930_v42, %s1572_s25 }
 0x60d   :  { %739 = vrot.lane.b32.xlu1 %v1926_v41, %s1573_s4 }
 0x60f   :  { %737 = vrot.lane.b32.xlu0 %v1930_v42, %s1573_s4 }
 0x611   :  { %763 = vrot.lane.b32.xlu1 %v1926_v41, %s1574_s26 }
 0x613   :  { %761 = vrot.lane.b32.xlu0 %v1930_v42, %s1574_s26 }
 0x657   :  { %v704_v43 = vpop.permute.xlu1 %703 }
 0x658   :  { %v774_v47 = vsel %vm290_vm3, %v1434_v33, %v704_v43 }
 0x659   :  { %v702_v44 = vpop.permute.xlu0 %701 }
 0x65a   :  { %v773_v49 = vsel %vm290_vm3, %v654_v37, %v702_v44  ;;  %v805_v37 = vld [vmem:[%s2078_s3 + $0x30] sm:$0xff] }
 0x65b   :  { %v728_v45 = vpop.permute.xlu1 %727 }
 0x65c   :  { %v783_v50 = vsel %vm781_vm4, %v774_v47, %v728_v45  ;;  %v1251_v47 = vld [vmem:[%s2082_s7] ss:$0 sm:$0xff] }
 0x65d   :  { %v726_v46 = vpop.permute.xlu0 %725 }
 0x65e   :  { %v782_v52 = vsel %vm781_vm4, %v773_v49, %v726_v46 }
 0x65f   :  { %v752_v48 = vpop.permute.xlu1 %751 }
 0x660   :  { %v792_v54 = vsel %vm790_vm5, %v783_v50, %v752_v48 }
 0x661   :  { %v750_v55 = vpop.permute.xlu0 %749  ;;  %v808_v59 = vmul.f32 %v800_v53, %v792_v54 }
 0x662   :  { %v791_v56 = vsel %vm790_vm5, %v782_v52, %v750_v55 }
 0x663   :  { %v807_v57 = vmul.f32 %v799_v51, %v791_v56  ;;  %v708_v58 = vpop.permute.xlu1 %707 }
 0x664   :  { %v776_v63 = vsel %vm290_vm3, %v1437_v31, %v708_v58 }
 0x665   :  { %1452 = vmatprep.mubr.msk.f32.mxu1 %vm52_vm0, %v807_v57  ;;  %v706_v60 = vpop.permute.xlu0 %705 }
 0x666   :  { %1453 = vmatmul.mubr.msk.f32.vlgmr.msra.gmra.mxu1 %vm52_vm0, %v808_v59  ;;  %v775_v2 = vsel %vm290_vm3, %v664_v38, %v706_v60  ;;  %v806_v38 = vld [vmem:[%s2078_s3 + $0x38] sm:$0xff] }
 0x667   :  { %v732_v61 = vpop.permute.xlu1 %731 }
 0x668   :  { %v785_v3 = vsel %vm781_vm4, %v776_v63, %v732_v61 }
 0x669   :  { %v730_v62 = vpop.permute.xlu0 %729 }
 0x66a   :  { %v784_v5 = vsel %vm781_vm4, %v775_v2, %v730_v62  ;;  %v1544_v62 = vld [vmem:[%s2075_s0] sm:$0xff] }
 0x66b   :  { %v756_v0 = vpop.permute.xlu1 %755 }
 0x66c   :  { %v794_v7 = vsel %vm790_vm5, %v785_v3, %v756_v0 }
 0x66d   :  { %v754_v8 = vpop.permute.xlu0 %753  ;;  %v810_v12 = vmul.f32 %v802_v6, %v794_v7 }
 0x66e   :  { %v793_v9 = vsel %vm790_vm5, %v784_v5, %v754_v8 }
 0x66f   :  { %v809_v10 = vmul.f32 %v801_v4, %v793_v9  ;;  %v712_v11 = vpop.permute.xlu1 %711 }
 0x670   :  { %v778_v34 = vsel %vm290_vm3, %v1440_v39, %v712_v11 }
 0x671   :  { %1455 = vmatprep.mubr.msk.f32.mxu1 %vm52_vm0, %v809_v10  ;;  %v710_v13 = vpop.permute.xlu0 %709 }
 0x672   :  { %1456 = vmatmul.mubr.msk.f32.gmra.mxu1 %vm52_vm0, %v810_v12  ;;  %v777_v17 = vsel %vm290_vm3, %v674_v40, %v710_v13  ;;  %v1008_v12 = vld [vmem:[%s2083_s8 + $0x18] sm:$0xff]  ;;  %v1007_v13 = vld [vmem:[%s2083_s8 + $0x10] sm:$0xff] }
 0x673   :  { %v736_v15 = vpop.permute.xlu1 %735  ;;  %1464 = vmatprep.subr.mxu0 %v1008_v12 }
 0x674   :  { %v787_v18 = vsel %vm781_vm4, %v778_v34, %v736_v15  ;;  %1465 = vmatpush3.msra.mxu0 %v1008_v12  ;;  %v1006_v15 = vld [vmem:[%s2083_s8 + $0x8] sm:$0xff]  ;;  %v1106_v34 = vld [vmem:[%s2085_s10 + $0x38] sm:$0xff] }
 0x675   :  { %v734_v14 = vpop.permute.xlu0 %733  ;;  %1466 = vmatprep.subr.mxu0 %v1007_v13  ;;  %1475 = vmatprep.subr.mxu1 %v1106_v34 }
 0x676   :  { %v786_v20 = vsel %vm781_vm4, %v777_v17, %v734_v14  ;;  %1467 = vmatpush3.msra.mxu0 %v1007_v13  ;;  %v1005_v14 = vld [vmem:[%s2083_s8] sm:$0xff]  ;;  %1476 = vmatpush3.msra.mxu1 %v1106_v34  ;;  %v1104_v17 = vld [vmem:[%s2085_s10 + $0x28] sm:$0xff] }
 0x677   :  { %v760_v16 = vpop.permute.xlu1 %759  ;;  %1468 = vmatprep.subr.mxu0 %v1006_v15 }
 0x678   :  { %v796_v23 = vsel %vm790_vm5, %v787_v18, %v760_v16  ;;  %1469 = vmatpush3.msra.mxu0 %v1006_v15  ;;  %v1105_v16 = vld [vmem:[%s2085_s10 + $0x30] sm:$0xff]  ;;  %v1103_v18 = vld [vmem:[%s2085_s10 + $0x20] sm:$0xff] }
 0x679   :  { %v758_v24 = vpop.permute.xlu0 %757  ;;  %v812_v27 = vmul.f32 %v804_v21, %v796_v23  ;;  %1470 = vmatprep.subr.mxu0 %v1005_v14  ;;  %1477 = vmatprep.subr.mxu1 %v1105_v16 }
 0x67a   :  { %v795_v26 = vsel %vm790_vm5, %v786_v20, %v758_v24  ;;  %1471 = vmatpush3.msra.mxu0 %v1005_v14  ;;  %1478 = vmatpush3.msra.mxu1 %v1105_v16 }
 0x67b   :  { %v811_v25 = vmul.f32 %v803_v19, %v795_v26  ;;  %v716_v28 = vpop.permute.xlu1 %715  ;;  %1479 = vmatprep.subr.mxu1 %v1104_v17 }
 0x67c   :  { %v780_v35 = vsel %vm290_vm3, %v1926_v41, %v716_v28  ;;  %1480 = vmatpush3.msra.mxu1 %v1104_v17 }
 0x67d   :  { %1458 = vmatprep.mubr.msk.f32.mxu1 %vm52_vm0, %v811_v25  ;;  %v714_v30 = vpop.permute.xlu0 %713  ;;  %1481 = vmatprep.subr.mxu1 %v1103_v18  ;;  %v1252_v25 = vld [vmem:[%s2087_s12 + $0x1] ss:$0 sm:$0xff] }
 0x67e   :  { %1459 = vmatmul.mubr.msk.f32.gmra.mxu1 %vm52_vm0, %v812_v27  ;;  %v779_v36 = vsel %vm290_vm3, %v1930_v42, %v714_v30  ;;  %v1253_v30 = vld [vmem:[%s2088_s13 + $0x1] ss:$0 sm:$0xff] }
 0x67f   :  { %v740_v29 = vpop.permute.xlu1 %739  ;;  %1482 = vmatpush3.msra.mxu1 %v1103_v18 }
 0x680   :  { %v789_v33 = vsel %vm781_vm4, %v780_v35, %v740_v29 }
 0x681   :  { %v738_v32 = vpop.permute.xlu0 %737 }
 0x682   :  { %v788_v31 = vsel %vm781_vm4, %v779_v36, %v738_v32 }
 0x683   :  { %v764_v22 = vpop.permute.xlu1 %763 }
 0x684   :  { %v798_v39 = vsel %vm790_vm5, %v789_v33, %v764_v22 }
 0x685   :  { %v762_v40 = vpop.permute.xlu0 %761  ;;  %v814_v44 = vmul.f32 %v806_v38, %v798_v39  ;;  %v1100_v38 = vld [vmem:[%s2085_s10 + $0x8] sm:$0xff]  ;;  %v1099_v39 = vld [vmem:[%s2085_s10] sm:$0xff] }
 0x686   :  { %v797_v41 = vsel %vm790_vm5, %v788_v31, %v762_v40  ;;  %v1101_v31 = vld [vmem:[%s2085_s10 + $0x10] sm:$0xff]  ;;  %v1254_v40 = vld [vmem:[%s2084_s9] ss:$0 sm:$0xff] }
 0x687   :  { %v813_v43 = vmul.f32 %v805_v37, %v797_v41  ;;  %v1102_v37 = vld [vmem:[%s2085_s10 + $0x18] sm:$0xff]  ;;  %s1575_s10 = smov [#allocation2]  }
 0x688   :  { %1483 = vmatprep.subr.mxu1 %v1102_v37  ;;  %s1206_s9 = sshll.u32 %s1575_s10, 4  ;;  %s1207_s9 = int_to_ptr.vmem [resolvable:$true] %s1206_s9 }
 0x689   :  { %1461 = vmatprep.mubr.msk.f32.mxu1 %vm52_vm0, %v813_v43  ;;  %1484 = vmatpush3.msra.mxu1 %v1102_v37  ;;  %s1545_s29 = scalar_lea.vmem %s1207_s9, 256  ;;  %p1550_p1 = scmp.lt.s32.totalorder %s1207_s9, %s1207_s9 }
 0x68a   :  { %1462 = vmatmul.mubr.msk.f32.gmra.mxu1 %vm52_vm0, %v814_v44  ;;  %1485 = vmatprep.subr.mxu1 %v1101_v31  ;;  %p1546_p0 = scmp.ne.s32.totalorder %s1207_s9, %s1545_s29  ;;  %p1551_p2 = scmp.lt.s32.totalorder %s1545_s29, %s1545_s29 }
 0x68b   :  { %1486 = vmatpush3.msra.mxu1 %v1101_v31 }
 0x68c   :  { %1487 = vmatprep.subr.mxu1 %v1100_v38  ;;  %p1552_p3 = por %p1551_p2, %p1550_p1 }
 0x68d   :  { %1488 = vmatpush3.msra.mxu1 %v1100_v38 }
 0x68e   :  { %1489 = vmatprep.subr.mxu1 %v1099_v39  ;;  %p1553_p4 = pnand %p1552_p3, %p1546_p0 }
 0x68f   :  { %1490 = vmatpush3.msra.mxu1 %v1099_v39 }
 0x726   :  { %v1454_v42 = vpop.f32.mrf.mxu1 }
 0x727   :  { %v956_v50 = vadd.f32 %v1454_v42, %v1251_v47 }
 0x728   :  { %v909_v45 = vpop.f32.mrf.mxu1 }
 0x729   :  { %v955_v51 = vadd.f32 %v1251_v47, %v909_v45 }
 0x732   :  { %v1457_v46 = vpop.f32.mrf.mxu1 }
 0x733   :  { %v958_v52 = vadd.f32 %v1457_v46, %v956_v50 }
 0x734   :  { %v919_v48 = vpop.f32.mrf.mxu1 }
 0x735   :  { %v957_v54 = vadd.f32 %v955_v51, %v919_v48  ;;  %v1259_v48 = vld [vmem:[%s2086_s11] ss:$0 sm:$0xff] }
 0x73e   :  { %v1460_v49 = vpop.f32.mrf.mxu1 }
 0x73f   :  { %v960_v55 = vadd.f32 %v1460_v49, %v958_v52 }
 0x740   :  { %v929_v53 = vpop.f32.mrf.mxu1 }
 0x741   :  { %v959_v57 = vadd.f32 %v957_v54, %v929_v53 }
 0x74a   :  { %v1463_v56 = vpop.f32.mrf.mxu1 }
 0x74b   :  { %v962_v58 = vadd.f32 %v1463_v56, %v960_v55 }
 0x74c   :  { %v939_v59 = vpop.f32.mrf.mxu1 }
 0x74d   :  { %v2000_v60 = vadd.f32 %v962_v58, %v1658_v1  ;;  %v961_v61 = vadd.f32 %v959_v57, %v939_v59 }
 0x74f   :  { %v2005_v63 = vadd.f32 %v1544_v62, %v961_v61  ;;  %v970_v0 = vsel %vm52_vm0, %v2000_v60, 0.0 }
 0x750   :  { %971 = vadd.xlane.f32.xlu1 %v970_v0 }
 0x751   :  { %v967_v2 = vsel %vm52_vm0, %v2005_v63, 0.0 }
 0x752   :  { %968 = vadd.xlane.f32.xlu0 %v967_v2 }
 0x7d9   :  { %v972_v3 = vpop.xlane.xlu1 %971 }
 0x7da   :  { %v974_v4 = vmul.f32 0.03125, %v972_v3 }
 0x7db   :  { %v969_v5 = vpop.xlane.xlu0 %968 }
 0x7dc   :  { %v973_v1 = vmul.f32 0.03125, %v969_v5  ;;  %v976_v6 = vsub.f32 %v2000_v60, %v974_v4 }
 0x7de   :  { %v975_v7 = vsub.f32 %v2005_v63, %v973_v1  ;;  %v978_v10 = vmul.f32 %v976_v6, %v976_v6  ;;  %v992_v32 = vmul.f32 %v1252_v25, %v976_v6 }
 0x7e0   :  { %v977_v8 = vmul.f32 %v975_v7, %v975_v7  ;;  %v982_v11 = vsel %vm52_vm0, %v978_v10, 0.0  ;;  %v991_v28 = vmul.f32 %v1252_v25, %v975_v7 }
 0x7e2   :  { %v979_v9 = vsel %vm52_vm0, %v977_v8, 0.0 }
 0x7e3   :  { %980 = vadd.xlane.f32.xlu0 %v979_v9 }
 0x7e7   :  { %983 = vadd.xlane.f32.xlu0 %v982_v11 }
 0x86c   :  { %v981_v19 = vpop.xlane.xlu0 %980 }
 0x86d   :  { %v985_v20 = vmul.f32 0.032258064, %v981_v19 }
 0x86f   :  { %v993_v21 = vadd.f32 1e-06, %v985_v20 }
 0x870   :  { %v984_v23 = vpop.xlane.xlu0 %983 }
 0x871   :  { %1540 = vrsqrt.f32 %v993_v21  ;;  %v986_v24 = vmul.f32 0.032258064, %v984_v23 }
 0x873   :  { %v994_v26 = vadd.f32 1e-06, %v986_v24 }
 0x875   :  { %1542 = vrsqrt.f32 %v994_v26 }
 0x87e   :  { %v1541_v27 = vpop.eup %1540 }
 0x87f   :  { %v997_v29 = vmul.f32 %v1541_v27, %v991_v28 }
 0x881   :  { %v1003_v35 = vadd.f32 %v1253_v30, %v997_v29 }
 0x882   :  { %v1543_v22 = vpop.eup %1542 }
 0x883   :  { %v998_v36 = vmul.f32 %v1543_v22, %v992_v32  ;;  %1472 = vmatprep.mubr.msk.f32.mxu0 %vm52_vm0, %v1003_v35 }
 0x885   :  { %v1004_v33 = vadd.f32 %v1253_v30, %v998_v36 }
 0x887   :  { %1473 = vmatmul.mubr.msk.f32.vlgmr.msra.gmra.mxu0 %vm52_vm0, %v1004_v33 }
 0x947   :  { %v1474_v41 = vpop.f32.mrf.mxu0 }
 0x948   :  { %v1094_v43 = vadd.f32 %v1474_v41, %v1254_v40 }
 0x949   :  { %v1088_v44 = vpop.f32.mrf.mxu0 }
 0x94a   :  { %v1089_v42 = vadd.f32 %v1254_v40, %v1088_v44  ;;  %v1098_v46 = vmax.f32 %v1094_v43, 0.0 }
 0x94c   :  { %v1097_v45 = vmax.f32 %v1089_v42, 0.0 }
 0x94e   :  { %1491 = vmatprep.mubr.msk.f32.mxu1 %vm115_vm1, %v1097_v45 }
 0x94f   :  { %1492 = vmatmul.mubr.msk.f32.vlgmr.msra.gmra.mxu1 %vm115_vm1, %v1098_v46 }
 0xa0f   :  { %v1493_v47 = vpop.f32.mrf.mxu1 }
 0xa10   :  { %v1189_v49 = vadd.f32 %v1493_v47, %v2000_v60 }
 0xa11   :  { %v1179_v50 = vpop.f32.mrf.mxu1 }
 0xa12   :  { %v1198_v51 = vadd.f32 %v1259_v48, %v1189_v49  ;;  %v1188_v52 = vadd.f32 %v1179_v50, %v2005_v63 }
 0xa14   :  { %1200 = vst.msk [vmem:[#allocation2 + $0x8] sm:$0xff] %vm52_vm0, %v1198_v51  ;;  %v1197_v53 = vadd.f32 %v1259_v48, %v1188_v52 }
 0xa16   :  { %1199 = vst.msk [vmem:[#allocation2] sm:$0xff] %vm52_vm0, %v1197_v53 }
 0xa17   :  { %1556 = shalt.err (!%p1553_p4)
}
 0xa18   :  { %s1576_s11 = smov 128  }
 0xa19   :  { %1212 = dma.vmem_to_hbm [thread:$0]  %s1207_s9, 256, %s2089_s14, [#allocation3], %s1576_s11, %s1576_s11, %s1572_s25  }
 0xa1a   :  { %1565 = dma.done.wait [#allocation3], 256  }
 0xa1b   :  { %1566 = vsyncadd [#allocation3], 4294967040 }
 0xa1c   :  { %1216 = vsyncpa [#allocation3], 1 }

</bundles_post_ra>
